<compile_context>
chip_gen: v7x
topology: tpu7x:2x2x1
jax: 0.10.0
libtpu: 0.0.40
codegen_flags: <defaults>
</compile_context>

<pallas_src>
import jax
import jax.numpy as jnp
from jax.experimental import pallas as pl
from jax.experimental.pallas import tpu as pltpu

N_OC = 49              # conv out channels
N_POS = 16 * 7 * 7     # 784 voxels per channel
F1_IN = N_OC * N_POS   # 38416


# ---------------------------------------------------------------------------
# Kernel: whole forward pass for one batch tile.
# ---------------------------------------------------------------------------
def model_kernel(x_ref,      # VMEM (TM, 784)
                 w12_ref,    # VMEM (784, 33)  conv+f1+f2 folded weight
                 b12_ref,    # VMEM (1, 33)
                 w45_ref,    # VMEM (33, 25)   f4+f5 folded weight
                 b45_ref,    # VMEM (1, 25)
                 w7_ref,     # VMEM (25, 10)
                 out_ref):   # VMEM (TM, 10)
    x = x_ref[...]

    # f0+f1+f2 (folded) -> f3 Tanh
    h2 = jnp.tanh(
        jnp.dot(x, w12_ref[...], preferred_element_type=jnp.float32) + b12_ref[...])

    # f4+f5 (folded) -> f6 Tanh
    h4 = jnp.tanh(
        jnp.dot(h2, w45_ref[...], preferred_element_type=jnp.float32) + b45_ref[...])

    # f7 Linear 25->10 (no bias)
    logits = jnp.dot(h4, w7_ref[...], preferred_element_type=jnp.float32)

    # f8 LogSoftmax(dim=1)
    m = jnp.max(logits, axis=1, keepdims=True)
    z = logits - m
    lse = jnp.log(jnp.sum(jnp.exp(z), axis=1, keepdims=True))
    out_ref[...] = z - lse


# ---------------------------------------------------------------------------
# Parameter prep: fold conv into f1, then fold f1·f2 and f4·f5 (pure JAX glue).
# ---------------------------------------------------------------------------
def prepare_kernel_params(p):
    """p: PyTorch-layout params dict -> kernel-ready dict (all folds are exact)."""
    # W_eff[p, k] = sum_oc conv_w[oc] * W1[k, oc, p]      (conv fold)
    w_eff = jnp.einsum("kop,o->pk", p["w1"].reshape(57, N_OC, N_POS), p["conv_w"])
    w2t = p["w2"].T                      # (57, 33)
    w5t = p["w5"].T                      # (25, 25)
    return {
        "w12": w_eff @ w2t,                          # (784, 33)
        "b12": p["b1"].reshape(1, 57) @ w2t,         # (1, 33)
        "w45": p["w4"].T @ w5t,                      # (33, 25)
        "b45": p["b4"].reshape(1, 25) @ w5t,         # (1, 25)
        "w7": p["w7"].T,                             # (25, 10)
    }


# ---------------------------------------------------------------------------
# Wrapper: batch-tiled 1-D "parallel" grid, weights resident across iterations.
# ---------------------------------------------------------------------------
def conv3d_then_linear_88(x, kp, *, tm=1024):
    """x: (N, 784) float32, kp: output of prepare_kernel_params."""
    n = x.shape[0]

    if n <= 8:
        # Tiny batch: one full-array block (block_shape == array shape is legal).
        tm_eff = n
    else:
        # >= 2 grid steps so both v7x TensorCores get work; tile is a multiple
        # of 8 sublanes; ragged last block is masked by Pallas (no jnp.pad copy).
        half = pl.cdiv(n, 2)
        tm_eff = min(tm, ((half + 7) // 8) * 8)

    grid = (pl.cdiv(n, tm_eff),)

    def wspec(arr):                       # full-array block, resident across grid
        return pl.BlockSpec(arr.shape, lambda i: (0, 0))

    out = pl.pallas_call(
        model_kernel,
        out_shape=jax.ShapeDtypeStruct((n, 10), jnp.float32),
        grid=grid,
        in_specs=[
            pl.BlockSpec((tm_eff, N_POS), lambda i: (i, 0)),   # x: tiled over batch
            wspec(kp["w12"]), wspec(kp["b12"]),
            wspec(kp["w45"]), wspec(kp["b45"]),
            wspec(kp["w7"]),
        ],
        out_specs=pl.BlockSpec((tm_eff, 10), lambda i: (i, 0)),
        compiler_params=pltpu.CompilerParams(
            dimension_semantics=("parallel",),
            vmem_limit_bytes=32 << 20,    # safe on v5e/v6e/v7x; tm=1024 needs ~9 MiB
        ),
    )(x, kp["w12"], kp["b12"], kp["w45"], kp["b45"], kp["w7"])

    return out


# ---------------------------------------------------------------------------
# Deterministic synthetic parameters (PyTorch-like 1/sqrt(fan_in) scale).
# ---------------------------------------------------------------------------
def init_params(key):
    ks = jax.random.split(key, 8)

    def lin(k, fan_in, shape):
        return jax.random.normal(k, shape, jnp.float32) / jnp.sqrt(fan_in)

    return {
        "conv_w": lin(ks[0], 1, (N_OC,)),        # Conv3d weight (49,1,1,1,1) squeezed
        "w1": lin(ks[1], F1_IN, (57, F1_IN)),    # PyTorch (out, in) layouts below
        "b1": lin(ks[2], F1_IN, (57,)),
        "w2": lin(ks[3], 57, (33, 57)),
        "w4": lin(ks[4], 33, (25, 33)),
        "b4": lin(ks[5], 33, (25,)),
        "w5": lin(ks[6], 25, (25, 25)),
        "w7": lin(ks[7], 25, (10, 25)),
    }


def reference_forward(x, p):
    n = x.shape[0]
    # Conv3d 1x1x1: per-output-channel scaling, flatten as oc*784 + pos
    expanded = (x[:, None, :] * p["conv_w"][None, :, None]).reshape(n, F1_IN)
    h1 = expanded @ p["w1"].T + p["b1"]
    h2 = jnp.tanh(h1 @ p["w2"].T)
    h3 = h2 @ p["w4"].T + p["b4"]
    h4 = jnp.tanh(h3 @ p["w5"].T)
    logits = h4 @ p["w7"].T
    return jax.nn.log_softmax(logits, axis=1)


if __name__ == "__main__":
    key = jax.random.PRNGKey(0)
    kx, kp_key = jax.random.split(key)

    batch = 2
    x = jax.random.normal(kx, (batch, N_POS), jnp.float32)  # (2, 784) == (2,1,16,7,7) flat

    params = init_params(kp_key)
    kparams = prepare_kernel_params(params)

    out = conv3d_then_linear_88(x, kparams)
    out = jax.block_until_ready(out)

    expected = reference_forward(x, params)
    assert out.shape == (batch, 10)
    assert jnp.allclose(out, expected, atol=1e-3, rtol=1e-3), "mismatch vs reference"

    print("KERNEL_OK")
</pallas_src>

<mosaic_0001>
module attributes {stable_mosaic.version = 11 : i64} {
  func.func @model_kernel(%arg0: i32, %arg1: memref<2x784xf32, #tpu.memory_space<vmem>>, %arg2: memref<784x33xf32, #tpu.memory_space<vmem>>, %arg3: memref<1x33xf32, #tpu.memory_space<vmem>>, %arg4: memref<33x25xf32, #tpu.memory_space<vmem>>, %arg5: memref<1x25xf32, #tpu.memory_space<vmem>>, %arg6: memref<25x10xf32, #tpu.memory_space<vmem>>, %arg7: memref<2x10xf32, #tpu.memory_space<vmem>>) attributes {dimension_semantics = [#tpu.dimension_semantics<parallel>], iteration_bounds = array<i64: 1>, scalar_prefetch = 0 : i64, scratch_operands = 0 : i64, tpu.core_type = #tpu.core_type<tc>, window_params = [{transform_indices = @transform_0, window_bounds = array<i64: 2, 784>}, {pipeline_mode = #tpu.pipeline_mode<synchronous>, transform_indices = @transform_1, window_bounds = array<i64: 784, 33>}, {pipeline_mode = #tpu.pipeline_mode<synchronous>, transform_indices = @transform_2, window_bounds = array<i64: 1, 33>}, {pipeline_mode = #tpu.pipeline_mode<synchronous>, transform_indices = @transform_3, window_bounds = array<i64: 33, 25>}, {pipeline_mode = #tpu.pipeline_mode<synchronous>, transform_indices = @transform_4, window_bounds = array<i64: 1, 25>}, {pipeline_mode = #tpu.pipeline_mode<synchronous>, transform_indices = @transform_5, window_bounds = array<i64: 25, 10>}, {transform_indices = @transform_6, window_bounds = array<i64: 2, 10>}]} {
    %c0 = arith.constant 0 : index
    %c0_0 = arith.constant 0 : index
    %0 = vector.load %arg1[%c0, %c0_0] : memref<2x784xf32, #tpu.memory_space<vmem>>, vector<2x784xf32>
    %c0_1 = arith.constant 0 : index
    %c0_2 = arith.constant 0 : index
    %1 = vector.load %arg2[%c0_1, %c0_2] : memref<784x33xf32, #tpu.memory_space<vmem>>, vector<784x33xf32>
    %cst = arith.constant dense<0.000000e+00> : vector<2x33xf32>
    %2 = tpu.matmul %0, %1, %cst {dimension_numbers = #tpu.dot_dimension_numbers<[1], [0], [0], [1], [0, 0, 1, 1], [], []>} : vector<2x784xf32>, vector<784x33xf32>, vector<2x33xf32> -> vector<2x33xf32>
    %c0_3 = arith.constant 0 : index
    %c0_4 = arith.constant 0 : index
    %3 = vector.load %arg3[%c0_3, %c0_4] : memref<1x33xf32, #tpu.memory_space<vmem>>, vector<1x33xf32>
    %4 = vector.broadcast %3 : vector<1x33xf32> to vector<2x33xf32>
    %5 = arith.addf %2, %4 : vector<2x33xf32>
    %6 = math.tanh %5 : vector<2x33xf32>
    %c0_5 = arith.constant 0 : index
    %c0_6 = arith.constant 0 : index
    %7 = vector.load %arg4[%c0_5, %c0_6] : memref<33x25xf32, #tpu.memory_space<vmem>>, vector<33x25xf32>
    %cst_7 = arith.constant dense<0.000000e+00> : vector<2x25xf32>
    %8 = tpu.matmul %6, %7, %cst_7 {dimension_numbers = #tpu.dot_dimension_numbers<[1], [0], [0], [1], [0, 0, 1, 1], [], []>} : vector<2x33xf32>, vector<33x25xf32>, vector<2x25xf32> -> vector<2x25xf32>
    %c0_8 = arith.constant 0 : index
    %c0_9 = arith.constant 0 : index
    %9 = vector.load %arg5[%c0_8, %c0_9] : memref<1x25xf32, #tpu.memory_space<vmem>>, vector<1x25xf32>
    %10 = vector.broadcast %9 : vector<1x25xf32> to vector<2x25xf32>
    %11 = arith.addf %8, %10 : vector<2x25xf32>
    %12 = math.tanh %11 : vector<2x25xf32>
    %c0_10 = arith.constant 0 : index
    %c0_11 = arith.constant 0 : index
    %13 = vector.load %arg6[%c0_10, %c0_11] : memref<25x10xf32, #tpu.memory_space<vmem>>, vector<25x10xf32>
    %cst_12 = arith.constant dense<0.000000e+00> : vector<2x10xf32>
    %14 = tpu.matmul %12, %13, %cst_12 {dimension_numbers = #tpu.dot_dimension_numbers<[1], [0], [0], [1], [0, 0, 1, 1], [], []>} : vector<2x25xf32>, vector<25x10xf32>, vector<2x10xf32> -> vector<2x10xf32>
    %cst_13 = arith.constant dense<0xFF800000> : vector<2xf32>
    %15 = vector.multi_reduction <maximumf>, %14, %cst_13 [1] : vector<2x10xf32> to vector<2xf32>
    %16 = vector.shape_cast %15 : vector<2xf32> to vector<2x1xf32>
    %17 = vector.broadcast %16 : vector<2x1xf32> to vector<2x10xf32>
    %18 = arith.subf %14, %17 : vector<2x10xf32>
    %19 = math.exp %18 : vector<2x10xf32>
    %cst_14 = arith.constant dense<0.000000e+00> : vector<2xf32>
    %20 = vector.multi_reduction <add>, %19, %cst_14 [1] : vector<2x10xf32> to vector<2xf32>
    %21 = vector.shape_cast %20 : vector<2xf32> to vector<2x1xf32>
    %22 = math.log %21 : vector<2x1xf32>
    %23 = vector.broadcast %22 : vector<2x1xf32> to vector<2x10xf32>
    %24 = arith.subf %18, %23 : vector<2x10xf32>
    %c0_15 = arith.constant 0 : index
    %c0_16 = arith.constant 0 : index
    %25 = vector.load %arg7[%c0_15, %c0_16] : memref<2x10xf32, #tpu.memory_space<vmem>>, vector<2x10xf32>
    tpu.vector_store %arg7[%c0_15, %c0_16], %24 {strides = array<i32>} : memref<2x10xf32, #tpu.memory_space<vmem>>, vector<2x10xf32>,
    return
  }
  func.func @transform_0(%arg0: i32) -> (i32, i32) {
    %c0_i32 = arith.constant 0 : i32
    %c0_i32_0 = arith.constant 0 : i32
    return %arg0, %c0_i32 : i32, i32
  }
  func.func @transform_1(%arg0: i32) -> (i32, i32) {
    %c0_i32 = arith.constant 0 : i32
    %c0_i32_0 = arith.constant 0 : i32
    %c0_i32_1 = arith.constant 0 : i32
    return %c0_i32, %c0_i32_0 : i32, i32
  }
  func.func @transform_2(%arg0: i32) -> (i32, i32) {
    %c0_i32 = arith.constant 0 : i32
    %c0_i32_0 = arith.constant 0 : i32
    %c0_i32_1 = arith.constant 0 : i32
    return %c0_i32, %c0_i32_0 : i32, i32
  }
  func.func @transform_3(%arg0: i32) -> (i32, i32) {
    %c0_i32 = arith.constant 0 : i32
    %c0_i32_0 = arith.constant 0 : i32
    %c0_i32_1 = arith.constant 0 : i32
    return %c0_i32, %c0_i32_0 : i32, i32
  }
  func.func @transform_4(%arg0: i32) -> (i32, i32) {
    %c0_i32 = arith.constant 0 : i32
    %c0_i32_0 = arith.constant 0 : i32
    %c0_i32_1 = arith.constant 0 : i32
    return %c0_i32, %c0_i32_0 : i32, i32
  }
  func.func @transform_5(%arg0: i32) -> (i32, i32) {
    %c0_i32 = arith.constant 0 : i32
    %c0_i32_0 = arith.constant 0 : i32
    %c0_i32_1 = arith.constant 0 : i32
    return %c0_i32, %c0_i32_0 : i32, i32
  }
  func.func @transform_6(%arg0: i32) -> (i32, i32) {
    %c0_i32 = arith.constant 0 : i32
    %c0_i32_0 = arith.constant 0 : i32
    return %arg0, %c0_i32 : i32, i32
  }
}

</mosaic_0001>

<bundles_post_ra>
// kernel: tpu_custom_call.1
= control target key start
LH: loop header
LB: loop body
LE: loop exit
PB: predicated region body
PF: predicated region fallthrough
CT: control target
= control target key end

     0   :  { %v965_v43 = vmov 1983009808   ;;  %v137_v45 = vlaneseq  ;;  %s1379_s0 = inlined_call_operand.vmem [shape: f32[2,784], index: 0, kind: input, shape index: {}]   ;;  %s1380_s1 = inlined_call_operand.vmem [shape: f32[784,33], index: 1, kind: input, shape index: {}]   ;;  %s1381_s2 = inlined_call_operand.vmem [shape: f32[1,33], index: 2, kind: input, shape index: {}]   ;;  %s1382_s3 = inlined_call_operand.vmem [shape: f32[33,25], index: 3, kind: input, shape index: {}]   ;;  %s1383_s4 = inlined_call_operand.vmem [shape: f32[1,25], index: 4, kind: input, shape index: {}]   ;;  %s1384_s5 = inlined_call_operand.vmem [shape: f32[25,10], index: 5, kind: input, shape index: {}]   ;;  %s1385_s6 = inlined_call_operand.hbm [shape: f32[2,10], index: 6, kind: output, shape index: {}]  }
   0x1   :  { %v42_v0 = vld [vmem:[%s1380_s1 + $0x80] sm:$0xff]  ;;  %v43_v1 = vld [vmem:[%s1380_s1 + $0x88] sm:$0xff]  ;;  %v44_v11 = vld [vmem:[%s1380_s1 + $0x90] sm:$0xff]  ;;  %v135_v44 = vunpack.c.l.s4 %v965_v43 }
   0x2   :  { %v26_v2 = vld [vmem:[%s1380_s1] sm:$0xff]  ;;  %v813_v3 = vpack.c.bf16 %v43_v1, %v42_v0  ;;  %v27_v4 = vld [vmem:[%s1380_s1 + $0x8] sm:$0xff]  ;;  %v45_v13 = vld [vmem:[%s1380_s1 + $0x98] sm:$0xff]  ;;  %v138_v60 = vshrl.u32 %v137_v45, 7 }
   0x3   :  { %v74_v5 = vld [vmem:[%s1380_s1 + $0x180] sm:$0xff]  ;;  %v75_v6 = vld [vmem:[%s1380_s1 + $0x188] sm:$0xff]  ;;  %v815_v7 = vpack.c.bf16 %v27_v4, %v26_v2  ;;  %v28_v14 = vld [vmem:[%s1380_s1 + $0x10] sm:$0xff]  ;;  %v817_v16 = vpack.c.bf16 %v45_v13, %v44_v11  ;;  %v136_v59 = vunpack.c.0.s8 %v135_v44 }
   0x4   :  { %v845_v8 = vpack.c.bf16 %v75_v6, %v74_v5  ;;  %v58_v9 = vld [vmem:[%s1380_s1 + $0x100] sm:$0xff]  ;;  %v59_v10 = vld [vmem:[%s1380_s1 + $0x108] sm:$0xff]  ;;  %814 = vmatprep.subr.bf16.mxu0 %v813_v3  ;;  %v29_v15 = vld [vmem:[%s1380_s1 + $0x18] sm:$0xff] }
   0x5   :  { %v847_v12 = vpack.c.bf16 %v59_v10, %v58_v9  ;;  %816 = vmatpush3.bf16.msra.mxu0 %v815_v7  ;;  %v819_v17 = vpack.c.bf16 %v29_v15, %v28_v14  ;;  %v76_v18 = vld [vmem:[%s1380_s1 + $0x190] sm:$0xff]  ;;  %v77_v19 = vld [vmem:[%s1380_s1 + $0x198] sm:$0xff]  ;;  %v46_v23 = vld [vmem:[%s1380_s1 + $0xa0] sm:$0xff]  ;;  %v1150_v10 = vsub.s32 %v136_v59, %v138_v60 }
   0x6   :  { %846 = vmatprep.subr.bf16.mxu1 %v845_v8  ;;  %v60_v20 = vld [vmem:[%s1380_s1 + $0x110] sm:$0xff]  ;;  %v849_v21 = vpack.c.bf16 %v77_v19, %v76_v18  ;;  %v61_v22 = vld [vmem:[%s1380_s1 + $0x118] sm:$0xff]  ;;  %v47_v24 = vld [vmem:[%s1380_s1 + $0xa8] sm:$0xff]  ;;  %818 = vmatprep.subr.bf16.mxu0 %v817_v16 }
   0x7   :  { %848 = vmatpush3.bf16.msra.mxu1 %v847_v12  ;;  %v851_v25 = vpack.c.bf16 %v61_v22, %v60_v20  ;;  %v821_v26 = vpack.c.bf16 %v47_v24, %v46_v23  ;;  %v30_v27 = vld [vmem:[%s1380_s1 + $0x20] sm:$0xff]  ;;  %v31_v28 = vld [vmem:[%s1380_s1 + $0x28] sm:$0xff]  ;;  %v48_v35 = vld [vmem:[%s1380_s1 + $0xb0] sm:$0xff] }
   0x8   :  { %v78_v29 = vld [vmem:[%s1380_s1 + $0x1a0] sm:$0xff]  ;;  %850 = vmatprep.subr.bf16.mxu1 %v849_v21  ;;  %v79_v30 = vld [vmem:[%s1380_s1 + $0x1a8] sm:$0xff]  ;;  %v823_v33 = vpack.c.bf16 %v31_v28, %v30_v27  ;;  %v49_v36 = vld [vmem:[%s1380_s1 + $0xb8] sm:$0xff] }
   0x9   :  { %v62_v31 = vld [vmem:[%s1380_s1 + $0x120] sm:$0xff]  ;;  %v63_v32 = vld [vmem:[%s1380_s1 + $0x128] sm:$0xff]  ;;  %820 = vmatpush3.bf16.msra.mxu0 %v819_v17  ;;  %v853_v34 = vpack.c.bf16 %v79_v30, %v78_v29  ;;  %v32_v37 = vld [vmem:[%s1380_s1 + $0x30] sm:$0xff]  ;;  %v825_v39 = vpack.c.bf16 %v49_v36, %v48_v35 }
   0xa   :  { %822 = vmatprep.subr.bf16.mxu0 %v821_v26  ;;  %v855_v38 = vpack.c.bf16 %v63_v32, %v62_v31  ;;  %v33_v40 = vld [vmem:[%s1380_s1 + $0x38] sm:$0xff]  ;;  %v80_v41 = vld [vmem:[%s1380_s1 + $0x1b0] sm:$0xff]  ;;  %v50_v49 = vld [vmem:[%s1380_s1 + $0xc0] sm:$0xff] }
   0xb   :  { %852 = vmatpush3.bf16.msra.mxu1 %v851_v25  ;;  %v81_v42 = vld [vmem:[%s1380_s1 + $0x1b8] sm:$0xff]  ;;  %v64_v47 = vld [vmem:[%s1380_s1 + $0x130] sm:$0xff]  ;;  %v51_v50 = vld [vmem:[%s1380_s1 + $0xc8] sm:$0xff]  ;;  %v827_v51 = vpack.c.bf16 %v33_v40, %v32_v37 }
   0xc   :  { %854 = vmatprep.subr.bf16.mxu1 %v853_v34  ;;  %v857_v46 = vpack.c.bf16 %v81_v42, %v80_v41  ;;  %v65_v48 = vld [vmem:[%s1380_s1 + $0x138] sm:$0xff]  ;;  %v82_v52 = vld [vmem:[%s1380_s1 + $0x1c0] sm:$0xff]  ;;  %v83_v53 = vld [vmem:[%s1380_s1 + $0x1c8] sm:$0xff]  ;;  %v829_v55 = vpack.c.bf16 %v51_v50, %v50_v49 }
   0xd   :  { %824 = vmatpush3.bf16.msra.mxu0 %v823_v33  ;;  %v859_v54 = vpack.c.bf16 %v65_v48, %v64_v47  ;;  %v34_v56 = vld [vmem:[%s1380_s1 + $0x40] sm:$0xff]  ;;  %v35_v57 = vld [vmem:[%s1380_s1 + $0x48] sm:$0xff]  ;;  %v861_v61 = vpack.c.bf16 %v83_v53, %v82_v52  ;;  %v52_v63 = vld [vmem:[%s1380_s1 + $0xd0] sm:$0xff] }
   0xe   :  { %826 = vmatprep.subr.bf16.mxu0 %v825_v39  ;;  %v66_v58 = vld [vmem:[%s1380_s1 + $0x140] sm:$0xff]  ;;  %v67_v62 = vld [vmem:[%s1380_s1 + $0x148] sm:$0xff]  ;;  %v53_v0 = vld [vmem:[%s1380_s1 + $0xd8] sm:$0xff]  ;;  %v831_v3 = vpack.c.bf16 %v35_v57, %v34_v56 }
   0xf   :  { %856 = vmatpush3.bf16.msra.mxu1 %v855_v38  ;;  %v84_v1 = vld [vmem:[%s1380_s1 + $0x1d0] sm:$0xff]  ;;  %v85_v2 = vld [vmem:[%s1380_s1 + $0x1d8] sm:$0xff]  ;;  %v863_v5 = vpack.c.bf16 %v67_v62, %v66_v58  ;;  %v833_v6 = vpack.c.bf16 %v53_v0, %v52_v63  ;;  %v54_v12 = vld [vmem:[%s1380_s1 + $0xe0] sm:$0xff] }
  0x10   :  { %858 = vmatprep.subr.bf16.mxu1 %v857_v46  ;;  %v36_v4 = vld [vmem:[%s1380_s1 + $0x50] sm:$0xff]  ;;  %v37_v7 = vld [vmem:[%s1380_s1 + $0x58] sm:$0xff]  ;;  %v865_v11 = vpack.c.bf16 %v85_v2, %v84_v1  ;;  %v55_v13 = vld [vmem:[%s1380_s1 + $0xe8] sm:$0xff] }
  0x11   :  { %828 = vmatpush3.bf16.msra.mxu0 %v827_v51  ;;  %v68_v8 = vld [vmem:[%s1380_s1 + $0x150] sm:$0xff]  ;;  %v69_v9 = vld [vmem:[%s1380_s1 + $0x158] sm:$0xff]  ;;  %v86_v14 = vld [vmem:[%s1380_s1 + $0x1e0] sm:$0xff]  ;;  %v835_v16 = vpack.c.bf16 %v37_v7, %v36_v4  ;;  %v837_v19 = vpack.c.bf16 %v55_v13, %v54_v12 }
  0x12   :  { %830 = vmatprep.subr.bf16.mxu0 %v829_v55  ;;  %v87_v15 = vld [vmem:[%s1380_s1 + $0x1e8] sm:$0xff]  ;;  %v867_v17 = vpack.c.bf16 %v69_v9, %v68_v8  ;;  %v24_v18 = vld [vmem:[%s1379_s0] sm:$0xff]  ;;  %v56_v27 = vld [vmem:[%s1380_s1 + $0xf0] sm:$0xff] }
  0x13   :  { %860 = vmatpush3.bf16.msra.mxu1 %v859_v54  ;;  %v38_v20 = vld [vmem:[%s1380_s1 + $0x60] sm:$0xff]  ;;  %v39_v21 = vld [vmem:[%s1380_s1 + $0x68] sm:$0xff]  ;;  %v140_v23 = vrot.slane %v24_v18, %v1150_v10  ;;  %v133_v24 = vcombine.high %v24_v18, %v24_v18  ;;  %v869_v25 = vpack.c.bf16 %v87_v15, %v86_v14  ;;  %v57_v28 = vld [vmem:[%s1380_s1 + $0xf8] sm:$0xff] }
  0x14   :  { %862 = vmatprep.subr.bf16.mxu1 %v861_v61  ;;  %v70_v22 = vld [vmem:[%s1380_s1 + $0x160] sm:$0xff]  ;;  %v71_v26 = vld [vmem:[%s1380_s1 + $0x168] sm:$0xff]  ;;  %v88_v29 = vld [vmem:[%s1380_s1 + $0x1f0] sm:$0xff]  ;;  %v839_v33 = vpack.c.bf16 %v39_v21, %v38_v20  ;;  %v841_v35 = vpack.c.bf16 %v57_v28, %v56_v27 }
  0x15   :  { %832 = vmatpush3.bf16.msra.mxu0 %v831_v3  ;;  %v89_v30 = vld [vmem:[%s1380_s1 + $0x1f8] sm:$0xff]  ;;  %v148_v31 = vcombine.high %v140_v23, %v140_v23  ;;  %v147_v32 = vrot.slane %v133_v24, %v1150_v10  ;;  %v871_v34 = vpack.c.bf16 %v71_v26, %v70_v22  ;;  %v40_v36 = vld [vmem:[%s1380_s1 + $0x70] sm:$0xff]  ;;  %v106_v42 = vld [vmem:[%s1380_s1 + $0x280] sm:$0xff] }
  0x16   :  { %834 = vmatprep.subr.bf16.mxu0 %v833_v6  ;;  %v41_v37 = vld [vmem:[%s1380_s1 + $0x78] sm:$0xff]  ;;  %v72_v38 = vld [vmem:[%s1380_s1 + $0x170] sm:$0xff]  ;;  %v873_v40 = vpack.c.bf16 %v89_v30, %v88_v29  ;;  %v107_v43 = vld [vmem:[%s1380_s1 + $0x288] sm:$0xff] }
  0x17   :  { %864 = vmatpush3.bf16.msra.mxu1 %v863_v5  ;;  %v149_v39 = vcombine.high %v147_v32, %v147_v32  ;;  %239 = vmatprep.mubr.f32.mxu0 %v148_v31  ;;  %v73_v41 = vld [vmem:[%s1380_s1 + $0x178] sm:$0xff]  ;;  %v843_v44 = vpack.c.bf16 %v41_v37, %v40_v36  ;;  %v877_v46 = vpack.c.bf16 %v107_v43, %v106_v42  ;;  %v90_v47 = vld [vmem:[%s1380_s1 + $0x200] sm:$0xff]  ;;  %v91_v48 = vld [vmem:[%s1380_s1 + $0x208] sm:$0xff] }
  0x18   :  { %866 = vmatprep.subr.bf16.mxu1 %v865_v11  ;;  %v875_v45 = vpack.c.bf16 %v73_v41, %v72_v38  ;;  %v108_v49 = vld [vmem:[%s1380_s1 + $0x290] sm:$0xff]  ;;  %v109_v50 = vld [vmem:[%s1380_s1 + $0x298] sm:$0xff]  ;;  %v879_v51 = vpack.c.bf16 %v91_v48, %v90_v47  ;;  %v25_v53 = vld [vmem:[%s1379_s0 + $0x8] sm:$0x3f] }
  0x19   :  { %836 = vmatpush3.bf16.msra.mxu0 %v835_v16  ;;  %309 = vmatprep.mubr.f32.mxu1 %v149_v39  ;;  %v92_v52 = vld [vmem:[%s1380_s1 + $0x210] sm:$0xff]  ;;  %v122_v54 = vld [vmem:[%s1380_s1 + $0x300] sm:$0xff]  ;;  %v881_v55 = vpack.c.bf16 %v109_v50, %v108_v49  ;;  %v93_v56 = vld [vmem:[%s1380_s1 + $0x218] sm:$0xff]  ;;  %v150_v57 = vcombine.high %v25_v53, %v25_v53  ;;  %v1236_v58 = vrot.slane %v25_v53, %v1150_v10 }
  0x1a   :  { %838 = vmatprep.subr.bf16.mxu0 %v837_v19  ;;  %v123_v59 = vld [vmem:[%s1380_s1 + $0x308] sm:$0xff] }
  0x1b   :  { %868 = vmatpush3.bf16.msra.mxu1 %v867_v17 }
  0x1c   :  { %870 = vmatprep.subr.bf16.mxu1 %v869_v25 }
  0x1d   :  { %840 = vmatpush3.bf16.msra.mxu0 %v839_v33 }
  0x1e   :  { %842 = vmatprep.subr.bf16.mxu0 %v841_v35 }
  0x1f   :  { %872 = vmatpush3.bf16.msra.mxu1 %v871_v34 }
  0x20   :  { %874 = vmatprep.subr.bf16.mxu1 %v873_v40 }
  0x21   :  { %844 = vmatpush3.bf16.msra.mxu0 %v843_v44 }
  0x22   :  { %878 = vmatprep.subr.bf16.mxu0 %v877_v46 }
  0x23   :  { %876 = vmatpush3.bf16.msra.mxu1 %v875_v45 }
  0x24   :  { %11 = vsyncpa [#allocation3], 0  ;;  %v110_v60 = vld [vmem:[%s1380_s1 + $0x2a0] sm:$0xff]  ;;  %v111_v61 = vld [vmem:[%s1380_s1 + $0x2a8] sm:$0xff]  ;;  %v966_v62 = vmov 0.0|0.0   ;;  %v910_v63 = vpack.c.bf16 %v123_v59, %v122_v54  ;;  %240 = vmatmul.mubr.f32.vlgmr.msra.gmra.mrb[0].mxu0 %v140_v23  ;;  %v165_v0 = vcombine.high %v1236_v58, %v1236_v58  ;;  %v883_v1 = vpack.c.bf16 %v93_v56, %v92_v52 }
  0x25   :  { %909 = vmatprep.subr.bf16.mxu1 %v966_v62  ;;  %880 = vmatpush3.bf16.msra.mxu0 %v879_v51  ;;  %v885_v2 = vpack.c.bf16 %v111_v61, %v110_v60  ;;  %v94_v3 = vld [vmem:[%s1380_s1 + $0x220] sm:$0xff]  ;;  %v95_v4 = vld [vmem:[%s1380_s1 + $0x228] sm:$0xff]  ;;  %v164_v5 = vrot.slane %v150_v57, %v1150_v10  ;;  %v112_v6 = vld [vmem:[%s1380_s1 + $0x2b0] sm:$0xff]  ;;  %vm967_vm0 = vmmov 0   ;;  %v968_v8 = vmov 0.0  }
  0x26   :  { %310 = vmatmul.mubr.f32.vlgmr.msra.gmra.mrb[0].mxu1 %v147_v32  ;;  %882 = vmatprep.subr.bf16.mxu0 %v881_v55  ;;  %v113_v7 = vld [vmem:[%s1380_s1 + $0x2b8] sm:$0xff]  ;;  %vm172_vm1 = vcmask 130048   ;;  %v887_v9 = vpack.c.bf16 %v95_v4, %v94_v3  ;;  %v96_v11 = vld [vmem:[%s1380_s1 + $0x230] sm:$0xff]  ;;  %v114_v13 = vld [vmem:[%s1380_s1 + $0x2c0] sm:$0xff]  ;;  %vm472_vm2 = vcmask 1040384   ;;  %vm468_vm3 = vcmask 269312  }
  0x27   :  { %379 = vmatprep.mubr.f32.mxu0 %v165_v0  ;;  %911 = vmatpush3.bf16.msra.mxu1 %v910_v63  ;;  %v889_v10 = vpack.c.bf16 %v113_v7, %v112_v6  ;;  %v97_v12 = vld [vmem:[%s1380_s1 + $0x238] sm:$0xff]  ;;  %v115_v14 = vld [vmem:[%s1380_s1 + $0x2c8] sm:$0xff]  ;;  %v98_v17 = vld [vmem:[%s1380_s1 + $0x240] sm:$0xff]  ;;  %vm969_vm4 = vmmov 1   ;;  %vm551_vm6 = vcmask 203776   ;;  %vm628_vm7 = vcmask 74752  }
  0x28   :  { %786 = vmatprep.mubr.msk.f32.mxu1 %vm967_vm0, %v968_v8  ;;  %912 = vmatprep.subr.bf16.mxu1 %v966_v62  ;;  %v891_v15 = vpack.c.bf16 %v97_v12, %v96_v11  ;;  %v893_v16 = vpack.c.bf16 %v115_v14, %v114_v13  ;;  %v99_v18 = vld [vmem:[%s1380_s1 + $0x248] sm:$0xff]  ;;  %v116_v19 = vld [vmem:[%s1380_s1 + $0x2d0] sm:$0xff]  ;;  %v117_v20 = vld [vmem:[%s1380_s1 + $0x2d8] sm:$0xff] }
  0x29   :  { %884 = vmatpush3.bf16.msra.mxu0 %v883_v1  ;;  %v895_v21 = vpack.c.bf16 %v99_v18, %v98_v17  ;;  %v897_v22 = vpack.c.bf16 %v117_v20, %v116_v19  ;;  %v100_v23 = vld [vmem:[%s1380_s1 + $0x250] sm:$0xff]  ;;  %v101_v24 = vld [vmem:[%s1380_s1 + $0x258] sm:$0xff]  ;;  %v118_v25 = vld [vmem:[%s1380_s1 + $0x2e0] sm:$0xff] }
  0x2a   :  { %886 = vmatprep.subr.bf16.mxu0 %v885_v2  ;;  %787 = vmatmul.mubr.msk.f32.vlgmr.msra.gmra.mrb[2].mxu1 %vm172_vm1, %v164_v5  ;;  %v119_v26 = vld [vmem:[%s1380_s1 + $0x2e8] sm:$0xff]  ;;  %v899_v27 = vpack.c.bf16 %v101_v24, %v100_v23  ;;  %v102_v29 = vld [vmem:[%s1380_s1 + $0x260] sm:$0xff]  ;;  %v120_v31 = vld [vmem:[%s1380_s1 + $0x2f0] sm:$0xff] }
  0x2b   :  { %799 = vmatprep.mubr.msk.f32.mxu1 %vm967_vm0, %v968_v8  ;;  %v901_v28 = vpack.c.bf16 %v119_v26, %v118_v25  ;;  %v103_v30 = vld [vmem:[%s1380_s1 + $0x268] sm:$0xff]  ;;  %v121_v32 = vld [vmem:[%s1380_s1 + $0x2f8] sm:$0xff]  ;;  %v104_v35 = vld [vmem:[%s1380_s1 + $0x270] sm:$0xff] }
  0x2c   :  { %v903_v33 = vpack.c.bf16 %v103_v30, %v102_v29  ;;  %v905_v34 = vpack.c.bf16 %v121_v32, %v120_v31  ;;  %v105_v36 = vld [vmem:[%s1380_s1 + $0x278] sm:$0xff]  ;;  %v456_v38 = vld [vmem:[%s1382_s3] sm:$0xff]  ;;  %v457_v39 = vld [vmem:[%s1382_s3 + $0x8] sm:$0xff] }
  0x2d   :  { %888 = vmatpush3.bf16.msra.mxu0 %v887_v9  ;;  %v907_v37 = vpack.c.bf16 %v105_v36, %v104_v35  ;;  %v913_v40 = vpack.c.bf16 %v457_v39, %v456_v38  ;;  %v458_v41 = vld [vmem:[%s1382_s3 + $0x10] sm:$0xff]  ;;  %v459_v42 = vld [vmem:[%s1382_s3 + $0x18] sm:$0xff]  ;;  %v460_v44 = vld [vmem:[%s1382_s3 + $0x20] sm:$0x1] }
  0x2e   :  { %890 = vmatprep.subr.bf16.mxu0 %v889_v10  ;;  %v916_v43 = vpack.c.bf16 %v459_v42, %v458_v41  ;;  %v656_v46 = vld [vmem:[%s1381_s2] ss:$0 sm:$0xff]  ;;  %v548_v0 = vld [vmem:[%s1384_s5 + $0x8] sm:$0xff]  ;;  %v549_v1 = vld [vmem:[%s1384_s5 + $0x10] sm:$0xff] }
  0x2f   :  { %914 = vmatpush3.bf16.msra.mxu1 %v913_v40  ;;  %v547_v63 = vld [vmem:[%s1384_s5] sm:$0xff]  ;;  %v550_v3 = vld [vmem:[%s1384_s5 + $0x18] sm:$0x1]  ;;  %vm923_vm5 = vmpackc.low %vm472_vm2, %vm969_vm4 }
  0x30   :  { %915 = vmatprep.subr.bf16.mxu1 %v966_v62  ;;  %v919_v2 = vpack.c.bf16 %v548_v0, %v547_v63  ;;  %v922_v4 = vpack.c.bf16 %v550_v3, %v549_v1  ;;  %v658_v5 = vld [vmem:[%s1383_s4] ss:$0 sm:$0xff]  ;;  %s970_s4 = smov [#allocation2]  }
  0x31   :  { %892 = vmatpush3.bf16.msra.mxu0 %v891_v15  ;;  %s648_s5 = sshll.u32 %s970_s4, 4  ;;  %s649_s5 = int_to_ptr.vmem [resolvable:$true] %s648_s5 }
  0x32   :  { %894 = vmatprep.subr.bf16.mxu0 %v893_v16  ;;  %s941_s21 = scalar_lea.vmem %s649_s5, 32  ;;  %p946_p1 = scmp.lt.s32.totalorder %s649_s5, %s649_s5 }
  0x33   :  { %917 = vmatpush3.bf16.msra.mxu1 %v916_v43  ;;  %p942_p0 = scmp.ne.s32.totalorder %s649_s5, %s941_s21  ;;  %p947_p2 = scmp.lt.s32.totalorder %s941_s21, %s941_s21 }
  0x34   :  { %797 = vmatprep.subr.mxu1 %v968_v8 }
  0x35   :  { %896 = vmatpush3.bf16.msra.mxu0 %v895_v21  ;;  %p948_p3 = por %p947_p2, %p946_p1 }
  0x36   :  { %898 = vmatprep.subr.bf16.mxu0 %v897_v22 }
  0x37   :  { %798 = vmatpush3.msk.msra.mxu1 %vm472_vm2, %v460_v44  ;;  %p949_p4 = pnand %p948_p3, %p942_p0 }
  0x38   :  { %918 = vmatprep.subr.bf16.mxu1 %v966_v62 }
  0x39   :  { %900 = vmatpush3.bf16.msra.mxu0 %v899_v27 }
  0x3a   :  { %902 = vmatprep.subr.bf16.mxu0 %v901_v28 }
  0x3d   :  { %904 = vmatpush3.bf16.msra.mxu0 %v903_v33 }
  0x3e   :  { %906 = vmatprep.subr.bf16.mxu0 %v905_v34 }
  0x41   :  { %908 = vmatpush3.bf16.msra.mxu0 %v907_v37 }
  0x44   :  { %380 = vmatmul.mubr.f32.vlgmr.msra.gmra.mrb[2].mxu0 %v1236_v58 }
  0xf7   :  { %v695_v45 = vpop.f32.mrb[0].mxu0 }
  0xf8   :  { %v696_v47 = vpop.f32.mrb[1].mxu0 }
  0xf9   :  { %v730_v48 = vpop.f32.mrb[0].mxu1  ;;  %v697_v49 = vadd.f32 %v696_v47, %v695_v45 }
  0xfa   :  { %v731_v50 = vpop.f32.mrb[1].mxu1 }
  0xfb   :  { %v732_v51 = vadd.f32 %v731_v50, %v730_v48  ;;  %v242_v52 = vadd.f32 %v697_v49, %v656_v46 }
  0xfd   :  { %v312_v53 = vadd.f32 %v732_v51, %v242_v52  ;;  %v451_v54 = vpop.f32.mrb[2].mxu1 }
  0xfe   :  { %v788_v55 = vpop.f32.mrb[3].mxu1 }
 0x117   :  { %v765_v56 = vpop.f32.mrb[2].mxu0 }
 0x118   :  { %v766_v57 = vpop.f32.mrb[3].mxu0 }
 0x119   :  { %v767_v58 = vadd.f32 %v766_v57, %v765_v56 }
 0x11b   :  { %v382_v59 = vadd.f32 %v767_v58, %v312_v53 }
 0x11d   :  { %v452_v60 = vadd.f32 %v451_v54, %v382_v59 }
 0x11f   :  { %933 = vtanh.f32 %v452_v60 }
 0x129   :  { %v934_v61 = vpop.eup %933 }
 0x12a   :  { %800 = vmatmul.mubr.msk.f32.vlgmr.msra.gmra.mrb[4].mxu1 %vm468_vm3, %v934_v61 }
 0x12b   :  { %810 = vmatprep.mubr.msk.f32.mxu1 %vm967_vm0, %v968_v8  ;;  %920 = vmatpush3.bf16.msra.mxu1 %v919_v2 }
 0x12c   :  { %921 = vmatprep.subr.bf16.mxu1 %v966_v62 }
 0x12f   :  { %924 = vmatpush3.bf16.msk.msra.mxu1 %vm923_vm5, %v922_v4 }
 0x1fd   :  { %v542_v6 = vpop.f32.mrb[4].mxu1 }
 0x1fe   :  { %v543_v7 = vadd.f32 %v658_v5, %v542_v6  ;;  %v801_v8 = vpop.f32.mrb[5].mxu1 }
 0x200   :  { %935 = vtanh.f32 %v543_v7 }
 0x20a   :  { %v936_v9 = vpop.eup %935 }
 0x20b   :  { %811 = vmatmul.mubr.msk.f32.vlgmr.msra.gmra.mrb[6].mxu1 %vm551_vm6, %v936_v9 }
 0x2de   :  { %v624_v10 = vpop.f32.mrb[6].mxu1 }
 0x2df   :  { %v812_v11 = vpop.f32.mrb[7].mxu1  ;;  %v629_v62 = vsel %vm628_vm7, %v624_v10, -inf }
 0x2e0   :  { %630 = vmax.xlane.f32.xlu0 %v629_v62 }
 0x36d   :  { %v631_v12 = vpop.xlane.xlu0 %630 }
 0x36e   :  { %v632_v13 = vsub.f32 %v624_v10, %v631_v12 }
 0x370   :  { %v633_v14 = vmul.f32 1.442695, %v632_v13 }
 0x372   :  { %937 = vpow2.f32 %v633_v14 }
 0x37c   :  { %v938_v15 = vpop.eup %937 }
 0x37d   :  { %v635_v16 = vsel %vm628_vm7, %v938_v15, 0.0 }
 0x37e   :  { %636 = vadd.xlane.f32.xlu0 %v635_v16 }
 0x40b   :  { %v637_v17 = vpop.xlane.xlu0 %636 }
 0x40c   :  { %939 = vlog2.f32 %v637_v17 }
 0x416   :  { %v940_v18 = vpop.eup %939 }
 0x417   :  { %v639_v19 = vmul.f32 0.6931472, %v940_v18 }
 0x419   :  { %v640_v20 = vsub.f32 %v632_v13, %v639_v19 }
 0x41b   :  { %641 = vst.msk [vmem:[#allocation2] sm:$0x3] %vm628_vm7, %v640_v20 }
 0x41c   :  { %952 = shalt.err (!%p949_p4)
}
 0x41d   :  { %s953_s24 = scalar_lea.hbm %s1385_s6, 32 }
 0x41e   :  { %p954_p5 = scmp.ne.s32.totalorder %s1385_s6, %s953_s24  ;;  %p957_p6 = scmp.lt.u32.totalorder %s953_s24, %s1385_s6 }
 0x420   :  { %p959_p7 = pnand %p957_p6, %p954_p5 }
 0x422   :  { %962 = shalt.err (!%p959_p7)
}
 0x423   :  { %651 = dma.vmem_to_hbm [thread:$0]  %s649_s5, 32, %s1385_s6, [#allocation3]  }
 0x424   :  { %963 = dma.done.wait [#allocation3], 32  }
 0x425   :  { %964 = vsyncadd [#allocation3], 4294967264 }
 0x426   :  { %655 = vsyncpa [#allocation3], 1 }

</bundles_post_ra>
